<compile_context>
chip_gen: v7x
topology: tpu7x:2x2x1
jax: 0.10.0
libtpu: 0.0.40
codegen_flags: <defaults>
</compile_context>

<pallas_src>
import functools

import jax
import jax.numpy as jnp
import numpy as np
from jax import lax
from jax.experimental import pallas as pl
from jax.experimental.pallas import tpu as pltpu


def _residual_block_kernel(H, W, x_ref, w1t_ref, b1_ref, w2t_ref, b2_ref, out_ref):
    """One grid step processes NB images in a lane-dense (C, NB*H*W) layout.

    x_ref   : (NB, C, HW)   input block (NCHW, spatially flattened); also the identity
    w1t_ref : (C, 9*C)      conv1 weights (bf16), column order (kh*3+kw)*C + ci
    b1_ref  : (C, 1)        f32
    w2t_ref : (C, 9*C)      conv2 weights (bf16)
    b2_ref  : (C, 1)        f32
    out_ref : (NB, C, HW)   output (lane-dense stores: last dim = HW)
    """
    NB, C, HW = x_ref.shape
    f32 = jnp.float32
    bf16 = jnp.bfloat16

    # ---- per-tap SAME-padding validity masks on the flattened H*W lane axis ----
    # Position p -> (h, w); tap (dh, dw) is valid iff 0 <= h+dh < H and 0 <= w+dw < W.
    # h-conditions reduce to flat-index comparisons (no division needed); w-conditions
    # need p mod W (cheap bitwise-and for power-of-two W).
    col = lax.broadcasted_iota(jnp.int32, (1, HW), 1)
    if (W & (W - 1)) == 0:
        w_pos = jnp.bitwise_and(col, W - 1)
    else:
        w_pos = col % W            # fallback path (not exercised in the test)
    m_h_lo = col >= W              # h >= 1        (needed when dh == -1)
    m_h_hi = col < (H - 1) * W     # h <= H - 2    (needed when dh == +1)
    m_w_lo = w_pos != 0            # w >= 1        (needed when dw == -1)
    m_w_hi = w_pos != (W - 1)      # w <= W - 2    (needed when dw == +1)

    def tap_mask(dh, dw):
        ms = []
        if dh == -1:
            ms.append(m_h_lo)
        elif dh == 1:
            ms.append(m_h_hi)
        if dw == -1:
            ms.append(m_w_lo)
        elif dw == 1:
            ms.append(m_w_hi)
        if not ms:
            return None
        m = ms[0]
        for extra in ms[1:]:
            m = jnp.logical_and(m, extra)
        return m

    # Static tap table: (lane-rotation amount, validity mask). For valid output lanes the
    # source lane p + dh*W + dw stays inside the image, so a full-length rotate is exact;
    # invalid lanes (halo reads) are masked to zero.
    taps = []
    for kh in range(3):
        for kw in range(3):
            dh, dw = kh - 1, kw - 1
            shift = (-(dh * W + dw)) % HW
            taps.append((shift, tap_mask(dh, dw)))

    def im2col(get_image):
        # Build the (9*C, NB*HW) patch entirely in registers (no VMEM round trip).
        cols = []
        for n in range(NB):
            img = get_image(n)                               # (C, HW) f32
            rows = []
            for shift, mask in taps:
                v = img if shift == 0 else pltpu.roll(img, shift=shift, axis=1)
                if mask is not None:
                    v = jnp.where(mask, v, 0.0)
                rows.append(v)
            cols.append(jnp.concatenate(rows, axis=0))       # (9*C, HW) f32
        patch = cols[0] if NB == 1 else jnp.concatenate(cols, axis=1)
        return patch.astype(bf16)                            # bf16 MXU operand

    # ---- conv1: bias + ReLU (ConvBlock) ----
    patch1 = im2col(lambda n: x_ref[n].astype(f32))
    acc1 = jnp.dot(w1t_ref[...], patch1, preferred_element_type=f32)   # (C, NB*HW)
    out1 = jnp.maximum(acc1 + b1_ref[...], 0.0)

    # ---- conv2: bias, no ReLU before the residual add ----
    patch2 = im2col(lambda n: out1[:, n * HW:(n + 1) * HW])
    acc2 = jnp.dot(w2t_ref[...], patch2, preferred_element_type=f32)   # (C, NB*HW)
    acc2 = acc2 + b2_ref[...]

    # ---- residual add (identity re-read from VMEM, short live range) + final ReLU ----
    for n in range(NB):
        res = acc2[:, n * HW:(n + 1) * HW] + x_ref[n].astype(f32)
        out_ref[n] = jnp.maximum(res, 0.0).astype(out_ref.dtype)       # lane-dense store


def _pick_nb(N, C, HW, budget_bytes=8 << 20):
    """Images folded into one grid step (lane dim becomes NB*HW).

    Largest divisor of N whose in-flight patch/activation footprint fits a conservative
    VMEM budget, then reduced (if the batch allows) so the grid keeps >= 2 steps and the
    "parallel" batch axis can still split across v7x's two TensorCores (neutral on
    v5e/v6e, which have a single TC).
    """
    best = 1
    for cand in range(1, N + 1):
        if N % cand:
            continue
        footprint = 9 * C * cand * HW * 2 * 4   # bf16 patch + f32 activations, x4 slack
        if footprint <= budget_bytes:
            best = cand
    while best > 1 and (N // best) < 2:
        best -= 1
        while best > 1 and N % best:
            best -= 1
    return max(best, 1)


def residual_block(x_nchw, w1_oihw, b1, w2_oihw, b2, nb=None):
    """x_nchw: (N, C, H, W) float32; weights in PyTorch OIHW layout."""
    N, Cin, H, W = x_nchw.shape
    Cout = w1_oihw.shape[0]
    assert Cin == Cout, "identity shortcut requires in_channels == out_channels"
    HW = H * W
    if nb is None:
        nb = _pick_nb(N, Cin, HW)
    assert N % nb == 0

    # Layout glue (no transposes of the activations, no spatial padding):
    x_flat = x_nchw.reshape(N, Cin, HW)                      # NCHW, spatially flattened
    # OIHW -> (Cout, 9*Cin) with column order (kh*3+kw)*Cin + ci (matches im2col rows);
    # bf16 MXU operands, f32 accumulation inside the kernel.
    w1t = jnp.transpose(w1_oihw, (0, 2, 3, 1)).reshape(Cout, 9 * Cin).astype(jnp.bfloat16)
    w2t = jnp.transpose(w2_oihw, (0, 2, 3, 1)).reshape(Cout, 9 * Cout).astype(jnp.bfloat16)
    b1c = b1.reshape(Cout, 1).astype(jnp.float32)
    b2c = b2.reshape(Cout, 1).astype(jnp.float32)

    kernel = functools.partial(_residual_block_kernel, H, W)

    out_flat = pl.pallas_call(
        kernel,
        out_shape=jax.ShapeDtypeStruct((N, Cout, HW), x_nchw.dtype),
        grid_spec=pltpu.PrefetchScalarGridSpec(
            num_scalar_prefetch=0,
            grid=(N // nb,),
            in_specs=[
                pl.BlockSpec((nb, Cin, HW), lambda g: (g, 0, 0)),
                pl.BlockSpec((Cout, 9 * Cin), lambda g: (0, 0)),
                pl.BlockSpec((Cout, 1), lambda g: (0, 0)),
                pl.BlockSpec((Cout, 9 * Cout), lambda g: (0, 0)),
                pl.BlockSpec((Cout, 1), lambda g: (0, 0)),
            ],
            out_specs=pl.BlockSpec((nb, Cout, HW), lambda g: (g, 0, 0)),
        ),
        compiler_params=pltpu.CompilerParams(
            dimension_semantics=("parallel",)),              # megacore split on v7x
    )(x_flat, w1t, b1c, w2t, b2c)

    # (N, Cout, H*W) is already NCHW order -> pure metadata reshape.
    return out_flat.reshape(N, Cout, H, W)


def _reference(x_nchw, w1_oihw, b1, w2_oihw, b2):
    """Pure-JAX NCHW f32 reference matching the PyTorch module semantics."""
    dn = lax.conv_dimension_numbers(x_nchw.shape, w1_oihw.shape,
                                    ("NCHW", "OIHW", "NCHW"))
    c1 = lax.conv_general_dilated(x_nchw, w1_oihw, (1, 1), ((1, 1), (1, 1)),
                                  dimension_numbers=dn)
    c1 = jnp.maximum(c1 + b1[None, :, None, None], 0.0)
    c2 = lax.conv_general_dilated(c1, w2_oihw, (1, 1), ((1, 1), (1, 1)),
                                  dimension_numbers=dn)
    c2 = c2 + b2[None, :, None, None]
    return jnp.maximum(c2 + x_nchw, 0.0)


if __name__ == "__main__":
    # Small shapes consistent with the module (stride=1, identity shortcut).
    # N=4 so the auto-picked NB=2 exercises multi-image steps with a grid of 2.
    N, C, H, W = 4, 4, 16, 16
    key = jax.random.PRNGKey(0)
    kx, k1, kb1, k2, kb2 = jax.random.split(key, 5)

    x = jax.random.normal(kx, (N, C, H, W), dtype=jnp.float32)
    # Deterministic synthetic parameters (PyTorch Conv2d weight shape: OIHW).
    w1 = jax.random.normal(k1, (C, C, 3, 3), dtype=jnp.float32) * 0.1
    b1 = jax.random.normal(kb1, (C,), dtype=jnp.float32) * 0.1
    w2 = jax.random.normal(k2, (C, C, 3, 3), dtype=jnp.float32) * 0.1
    b2 = jax.random.normal(kb2, (C,), dtype=jnp.float32) * 0.1

    out = jax.block_until_ready(residual_block(x, w1, b1, w2, b2))
    ref = jax.block_until_ready(_reference(x, w1, b1, w2, b2))

    # bf16 MXU operands with f32 accumulation -> ~1e-2 level differences vs f32 reference.
    np.testing.assert_allclose(np.asarray(out), np.asarray(ref), rtol=3e-2, atol=3e-2)
    print("KERNEL_OK")
</pallas_src>

<mosaic_0001>
module attributes {stable_mosaic.version = 11 : i64} {
  func.func @_residual_block_kernel(%arg0: i32, %arg1: memref<2x4x256xf32, #tpu.memory_space<vmem>>, %arg2: memref<4x36xbf16, #tpu.memory_space<vmem>>, %arg3: memref<4x1xf32, #tpu.memory_space<vmem>>, %arg4: memref<4x36xbf16, #tpu.memory_space<vmem>>, %arg5: memref<4x1xf32, #tpu.memory_space<vmem>>, %arg6: memref<2x4x256xf32, #tpu.memory_space<vmem>>) attributes {dimension_semantics = [#tpu.dimension_semantics<parallel>], iteration_bounds = array<i64: 2>, scalar_prefetch = 0 : i64, scratch_operands = 0 : i64, tpu.core_type = #tpu.core_type<tc>, window_params = [{transform_indices = @transform_0, window_bounds = array<i64: 2, 4, 256>}, {pipeline_mode = #tpu.pipeline_mode<synchronous>, transform_indices = @transform_1, window_bounds = array<i64: 4, 36>}, {pipeline_mode = #tpu.pipeline_mode<synchronous>, transform_indices = @transform_2, window_bounds = array<i64: 4, 1>}, {pipeline_mode = #tpu.pipeline_mode<synchronous>, transform_indices = @transform_3, window_bounds = array<i64: 4, 36>}, {pipeline_mode = #tpu.pipeline_mode<synchronous>, transform_indices = @transform_4, window_bounds = array<i64: 4, 1>}, {transform_indices = @transform_5, window_bounds = array<i64: 2, 4, 256>}]} {
    %0 = tpu.iota {dimensions = array<i32: 1>} : vector<1x256xi32>
    %c15_i32 = arith.constant 15 : i32
    %1 = vector.broadcast %c15_i32 : i32 to vector<1x256xi32>
    %2 = arith.andi %0, %1 : vector<1x256xi32>
    %c16_i32 = arith.constant 16 : i32
    %3 = vector.broadcast %c16_i32 : i32 to vector<1x256xi32>
    %4 = arith.cmpi sge, %0, %3 : vector<1x256xi32>
    %c240_i32 = arith.constant 240 : i32
    %5 = vector.broadcast %c240_i32 : i32 to vector<1x256xi32>
    %6 = arith.cmpi slt, %0, %5 : vector<1x256xi32>
    %c0_i32 = arith.constant 0 : i32
    %7 = vector.broadcast %c0_i32 : i32 to vector<1x256xi32>
    %8 = arith.cmpi ne, %2, %7 : vector<1x256xi32>
    %c15_i32_0 = arith.constant 15 : i32
    %9 = vector.broadcast %c15_i32_0 : i32 to vector<1x256xi32>
    %10 = arith.cmpi ne, %2, %9 : vector<1x256xi32>
    %11 = arith.andi %4, %8 : vector<1x256xi1>
    %12 = arith.andi %4, %10 : vector<1x256xi1>
    %13 = arith.andi %6, %8 : vector<1x256xi1>
    %14 = arith.andi %6, %10 : vector<1x256xi1>
    %c0 = arith.constant 0 : index
    %c0_1 = arith.constant 0 : index
    %c0_2 = arith.constant 0 : index
    %15 = vector.load %arg1[%c0, %c0_1, %c0_2] : memref<2x4x256xf32, #tpu.memory_space<vmem>>, vector<1x4x256xf32>
    %16 = vector.shape_cast %15 : vector<1x4x256xf32> to vector<4x256xf32>
    %c17_i32 = arith.constant 17 : i32
    %17 = tpu.dynamic_rotate %16 by %c17_i32 dim 1 : vector<4x256xf32>, i32 -> vector<4x256xf32>
    %cst = arith.constant 0.000000e+00 : f32
    %18 = vector.shape_cast %11 : vector<1x256xi1> to vector<1x256xi1>
    %19 = vector.broadcast %18 : vector<1x256xi1> to vector<4x256xi1>
    %20 = vector.broadcast %cst : f32 to vector<4x256xf32>
    %21 = arith.select %19, %17, %20 : vector<4x256xi1>, vector<4x256xf32>
    %c16_i32_3 = arith.constant 16 : i32
    %22 = tpu.dynamic_rotate %16 by %c16_i32_3 dim 1 : vector<4x256xf32>, i32 -> vector<4x256xf32>
    %cst_4 = arith.constant 0.000000e+00 : f32
    %23 = vector.shape_cast %4 : vector<1x256xi1> to vector<1x256xi1>
    %24 = vector.broadcast %23 : vector<1x256xi1> to vector<4x256xi1>
    %25 = vector.broadcast %cst_4 : f32 to vector<4x256xf32>
    %26 = arith.select %24, %22, %25 : vector<4x256xi1>, vector<4x256xf32>
    %c15_i32_5 = arith.constant 15 : i32
    %27 = tpu.dynamic_rotate %16 by %c15_i32_5 dim 1 : vector<4x256xf32>, i32 -> vector<4x256xf32>
    %cst_6 = arith.constant 0.000000e+00 : f32
    %28 = vector.shape_cast %12 : vector<1x256xi1> to vector<1x256xi1>
    %29 = vector.broadcast %28 : vector<1x256xi1> to vector<4x256xi1>
    %30 = vector.broadcast %cst_6 : f32 to vector<4x256xf32>
    %31 = arith.select %29, %27, %30 : vector<4x256xi1>, vector<4x256xf32>
    %c1_i32 = arith.constant 1 : i32
    %32 = tpu.dynamic_rotate %16 by %c1_i32 dim 1 : vector<4x256xf32>, i32 -> vector<4x256xf32>
    %cst_7 = arith.constant 0.000000e+00 : f32
    %33 = vector.shape_cast %8 : vector<1x256xi1> to vector<1x256xi1>
    %34 = vector.broadcast %33 : vector<1x256xi1> to vector<4x256xi1>
    %35 = vector.broadcast %cst_7 : f32 to vector<4x256xf32>
    %36 = arith.select %34, %32, %35 : vector<4x256xi1>, vector<4x256xf32>
    %c255_i32 = arith.constant 255 : i32
    %37 = tpu.dynamic_rotate %16 by %c255_i32 dim 1 : vector<4x256xf32>, i32 -> vector<4x256xf32>
    %cst_8 = arith.constant 0.000000e+00 : f32
    %38 = vector.shape_cast %10 : vector<1x256xi1> to vector<1x256xi1>
    %39 = vector.broadcast %38 : vector<1x256xi1> to vector<4x256xi1>
    %40 = vector.broadcast %cst_8 : f32 to vector<4x256xf32>
    %41 = arith.select %39, %37, %40 : vector<4x256xi1>, vector<4x256xf32>
    %c241_i32 = arith.constant 241 : i32
    %42 = tpu.dynamic_rotate %16 by %c241_i32 dim 1 : vector<4x256xf32>, i32 -> vector<4x256xf32>
    %cst_9 = arith.constant 0.000000e+00 : f32
    %43 = vector.shape_cast %13 : vector<1x256xi1> to vector<1x256xi1>
    %44 = vector.broadcast %43 : vector<1x256xi1> to vector<4x256xi1>
    %45 = vector.broadcast %cst_9 : f32 to vector<4x256xf32>
    %46 = arith.select %44, %42, %45 : vector<4x256xi1>, vector<4x256xf32>
    %c240_i32_10 = arith.constant 240 : i32
    %47 = tpu.dynamic_rotate %16 by %c240_i32_10 dim 1 : vector<4x256xf32>, i32 -> vector<4x256xf32>
    %cst_11 = arith.constant 0.000000e+00 : f32
    %48 = vector.shape_cast %6 : vector<1x256xi1> to vector<1x256xi1>
    %49 = vector.broadcast %48 : vector<1x256xi1> to vector<4x256xi1>
    %50 = vector.broadcast %cst_11 : f32 to vector<4x256xf32>
    %51 = arith.select %49, %47, %50 : vector<4x256xi1>, vector<4x256xf32>
    %c239_i32 = arith.constant 239 : i32
    %52 = tpu.dynamic_rotate %16 by %c239_i32 dim 1 : vector<4x256xf32>, i32 -> vector<4x256xf32>
    %cst_12 = arith.constant 0.000000e+00 : f32
    %53 = vector.shape_cast %14 : vector<1x256xi1> to vector<1x256xi1>
    %54 = vector.broadcast %53 : vector<1x256xi1> to vector<4x256xi1>
    %55 = vector.broadcast %cst_12 : f32 to vector<4x256xf32>
    %56 = arith.select %54, %52, %55 : vector<4x256xi1>, vector<4x256xf32>
    %57 = tpu.concatenate %21, %26, %31, %36, %16, %41, %46, %51, %56 in 0 : vector<4x256xf32>, vector<4x256xf32>, vector<4x256xf32>, vector<4x256xf32>, vector<4x256xf32>, vector<4x256xf32>, vector<4x256xf32>, vector<4x256xf32>, vector<4x256xf32> -> vector<36x256xf32>
    %c1 = arith.constant 1 : index
    %c0_13 = arith.constant 0 : index
    %c0_14 = arith.constant 0 : index
    %58 = vector.load %arg1[%c1, %c0_13, %c0_14] : memref<2x4x256xf32, #tpu.memory_space<vmem>>, vector<1x4x256xf32>
    %59 = vector.shape_cast %58 : vector<1x4x256xf32> to vector<4x256xf32>
    %c17_i32_15 = arith.constant 17 : i32
    %60 = tpu.dynamic_rotate %59 by %c17_i32_15 dim 1 : vector<4x256xf32>, i32 -> vector<4x256xf32>
    %cst_16 = arith.constant 0.000000e+00 : f32
    %61 = vector.shape_cast %11 : vector<1x256xi1> to vector<1x256xi1>
    %62 = vector.broadcast %61 : vector<1x256xi1> to vector<4x256xi1>
    %63 = vector.broadcast %cst_16 : f32 to vector<4x256xf32>
    %64 = arith.select %62, %60, %63 : vector<4x256xi1>, vector<4x256xf32>
    %c16_i32_17 = arith.constant 16 : i32
    %65 = tpu.dynamic_rotate %59 by %c16_i32_17 dim 1 : vector<4x256xf32>, i32 -> vector<4x256xf32>
    %cst_18 = arith.constant 0.000000e+00 : f32
    %66 = vector.shape_cast %4 : vector<1x256xi1> to vector<1x256xi1>
    %67 = vector.broadcast %66 : vector<1x256xi1> to vector<4x256xi1>
    %68 = vector.broadcast %cst_18 : f32 to vector<4x256xf32>
    %69 = arith.select %67, %65, %68 : vector<4x256xi1>, vector<4x256xf32>
    %c15_i32_19 = arith.constant 15 : i32
    %70 = tpu.dynamic_rotate %59 by %c15_i32_19 dim 1 : vector<4x256xf32>, i32 -> vector<4x256xf32>
    %cst_20 = arith.constant 0.000000e+00 : f32
    %71 = vector.shape_cast %12 : vector<1x256xi1> to vector<1x256xi1>
    %72 = vector.broadcast %71 : vector<1x256xi1> to vector<4x256xi1>
    %73 = vector.broadcast %cst_20 : f32 to vector<4x256xf32>
    %74 = arith.select %72, %70, %73 : vector<4x256xi1>, vector<4x256xf32>
    %c1_i32_21 = arith.constant 1 : i32
    %75 = tpu.dynamic_rotate %59 by %c1_i32_21 dim 1 : vector<4x256xf32>, i32 -> vector<4x256xf32>
    %cst_22 = arith.constant 0.000000e+00 : f32
    %76 = vector.shape_cast %8 : vector<1x256xi1> to vector<1x256xi1>
    %77 = vector.broadcast %76 : vector<1x256xi1> to vector<4x256xi1>
    %78 = vector.broadcast %cst_22 : f32 to vector<4x256xf32>
    %79 = arith.select %77, %75, %78 : vector<4x256xi1>, vector<4x256xf32>
    %c255_i32_23 = arith.constant 255 : i32
    %80 = tpu.dynamic_rotate %59 by %c255_i32_23 dim 1 : vector<4x256xf32>, i32 -> vector<4x256xf32>
    %cst_24 = arith.constant 0.000000e+00 : f32
    %81 = vector.shape_cast %10 : vector<1x256xi1> to vector<1x256xi1>
    %82 = vector.broadcast %81 : vector<1x256xi1> to vector<4x256xi1>
    %83 = vector.broadcast %cst_24 : f32 to vector<4x256xf32>
    %84 = arith.select %82, %80, %83 : vector<4x256xi1>, vector<4x256xf32>
    %c241_i32_25 = arith.constant 241 : i32
    %85 = tpu.dynamic_rotate %59 by %c241_i32_25 dim 1 : vector<4x256xf32>, i32 -> vector<4x256xf32>
    %cst_26 = arith.constant 0.000000e+00 : f32
    %86 = vector.shape_cast %13 : vector<1x256xi1> to vector<1x256xi1>
    %87 = vector.broadcast %86 : vector<1x256xi1> to vector<4x256xi1>
    %88 = vector.broadcast %cst_26 : f32 to vector<4x256xf32>
    %89 = arith.select %87, %85, %88 : vector<4x256xi1>, vector<4x256xf32>
    %c240_i32_27 = arith.constant 240 : i32
    %90 = tpu.dynamic_rotate %59 by %c240_i32_27 dim 1 : vector<4x256xf32>, i32 -> vector<4x256xf32>
    %cst_28 = arith.constant 0.000000e+00 : f32
    %91 = vector.shape_cast %6 : vector<1x256xi1> to vector<1x256xi1>
    %92 = vector.broadcast %91 : vector<1x256xi1> to vector<4x256xi1>
    %93 = vector.broadcast %cst_28 : f32 to vector<4x256xf32>
    %94 = arith.select %92, %90, %93 : vector<4x256xi1>, vector<4x256xf32>
    %c239_i32_29 = arith.constant 239 : i32
    %95 = tpu.dynamic_rotate %59 by %c239_i32_29 dim 1 : vector<4x256xf32>, i32 -> vector<4x256xf32>
    %cst_30 = arith.constant 0.000000e+00 : f32
    %96 = vector.shape_cast %14 : vector<1x256xi1> to vector<1x256xi1>
    %97 = vector.broadcast %96 : vector<1x256xi1> to vector<4x256xi1>
    %98 = vector.broadcast %cst_30 : f32 to vector<4x256xf32>
    %99 = arith.select %97, %95, %98 : vector<4x256xi1>, vector<4x256xf32>
    %100 = tpu.concatenate %64, %69, %74, %79, %59, %84, %89, %94, %99 in 0 : vector<4x256xf32>, vector<4x256xf32>, vector<4x256xf32>, vector<4x256xf32>, vector<4x256xf32>, vector<4x256xf32>, vector<4x256xf32>, vector<4x256xf32>, vector<4x256xf32> -> vector<36x256xf32>
    %101 = tpu.concatenate %57, %100 in 1 : vector<36x256xf32>, vector<36x256xf32> -> vector<36x512xf32>
    %102 = arith.truncf %101 : vector<36x512xf32> to vector<36x512xbf16>
    %c0_31 = arith.constant 0 : index
    %c0_32 = arith.constant 0 : index
    %103 = vector.load %arg2[%c0_31, %c0_32] : memref<4x36xbf16, #tpu.memory_space<vmem>>, vector<4x36xbf16>
    %cst_33 = arith.constant dense<0.000000e+00> : vector<4x512xf32>
    %104 = tpu.matmul %103, %102, %cst_33 {dimension_numbers = #tpu.dot_dimension_numbers<[1], [0], [0], [1], [0, 0, 1, 1], [], []>} : vector<4x36xbf16>, vector<36x512xbf16>, vector<4x512xf32> -> vector<4x512xf32>
    %c0_34 = arith.constant 0 : index
    %c0_35 = arith.constant 0 : index
    %105 = vector.load %arg3[%c0_34, %c0_35] : memref<4x1xf32, #tpu.memory_space<vmem>>, vector<4x1xf32>
    %106 = vector.broadcast %105 : vector<4x1xf32> to vector<4x512xf32>
    %107 = arith.addf %104, %106 : vector<4x512xf32>
    %cst_36 = arith.constant 0.000000e+00 : f32
    %108 = vector.broadcast %cst_36 : f32 to vector<4x512xf32>
    %109 = arith.maximumf %107, %108 : vector<4x512xf32>
    %110 = vector.extract_strided_slice %109 {offsets = [0, 0], sizes = [4, 256], strides = [1, 1]} : vector<4x512xf32> to vector<4x256xf32>
    %c17_i32_37 = arith.constant 17 : i32
    %111 = tpu.dynamic_rotate %110 by %c17_i32_37 dim 1 : vector<4x256xf32>, i32 -> vector<4x256xf32>
    %cst_38 = arith.constant 0.000000e+00 : f32
    %112 = vector.shape_cast %11 : vector<1x256xi1> to vector<1x256xi1>
    %113 = vector.broadcast %112 : vector<1x256xi1> to vector<4x256xi1>
    %114 = vector.broadcast %cst_38 : f32 to vector<4x256xf32>
    %115 = arith.select %113, %111, %114 : vector<4x256xi1>, vector<4x256xf32>
    %c16_i32_39 = arith.constant 16 : i32
    %116 = tpu.dynamic_rotate %110 by %c16_i32_39 dim 1 : vector<4x256xf32>, i32 -> vector<4x256xf32>
    %cst_40 = arith.constant 0.000000e+00 : f32
    %117 = vector.shape_cast %4 : vector<1x256xi1> to vector<1x256xi1>
    %118 = vector.broadcast %117 : vector<1x256xi1> to vector<4x256xi1>
    %119 = vector.broadcast %cst_40 : f32 to vector<4x256xf32>
    %120 = arith.select %118, %116, %119 : vector<4x256xi1>, vector<4x256xf32>
    %c15_i32_41 = arith.constant 15 : i32
    %121 = tpu.dynamic_rotate %110 by %c15_i32_41 dim 1 : vector<4x256xf32>, i32 -> vector<4x256xf32>
    %cst_42 = arith.constant 0.000000e+00 : f32
    %122 = vector.shape_cast %12 : vector<1x256xi1> to vector<1x256xi1>
    %123 = vector.broadcast %122 : vector<1x256xi1> to vector<4x256xi1>
    %124 = vector.broadcast %cst_42 : f32 to vector<4x256xf32>
    %125 = arith.select %123, %121, %124 : vector<4x256xi1>, vector<4x256xf32>
    %c1_i32_43 = arith.constant 1 : i32
    %126 = tpu.dynamic_rotate %110 by %c1_i32_43 dim 1 : vector<4x256xf32>, i32 -> vector<4x256xf32>
    %cst_44 = arith.constant 0.000000e+00 : f32
    %127 = vector.shape_cast %8 : vector<1x256xi1> to vector<1x256xi1>
    %128 = vector.broadcast %127 : vector<1x256xi1> to vector<4x256xi1>
    %129 = vector.broadcast %cst_44 : f32 to vector<4x256xf32>
    %130 = arith.select %128, %126, %129 : vector<4x256xi1>, vector<4x256xf32>
    %c255_i32_45 = arith.constant 255 : i32
    %131 = tpu.dynamic_rotate %110 by %c255_i32_45 dim 1 : vector<4x256xf32>, i32 -> vector<4x256xf32>
    %cst_46 = arith.constant 0.000000e+00 : f32
    %132 = vector.shape_cast %10 : vector<1x256xi1> to vector<1x256xi1>
    %133 = vector.broadcast %132 : vector<1x256xi1> to vector<4x256xi1>
    %134 = vector.broadcast %cst_46 : f32 to vector<4x256xf32>
    %135 = arith.select %133, %131, %134 : vector<4x256xi1>, vector<4x256xf32>
    %c241_i32_47 = arith.constant 241 : i32
    %136 = tpu.dynamic_rotate %110 by %c241_i32_47 dim 1 : vector<4x256xf32>, i32 -> vector<4x256xf32>
    %cst_48 = arith.constant 0.000000e+00 : f32
    %137 = vector.shape_cast %13 : vector<1x256xi1> to vector<1x256xi1>
    %138 = vector.broadcast %137 : vector<1x256xi1> to vector<4x256xi1>
    %139 = vector.broadcast %cst_48 : f32 to vector<4x256xf32>
    %140 = arith.select %138, %136, %139 : vector<4x256xi1>, vector<4x256xf32>
    %c240_i32_49 = arith.constant 240 : i32
    %141 = tpu.dynamic_rotate %110 by %c240_i32_49 dim 1 : vector<4x256xf32>, i32 -> vector<4x256xf32>
    %cst_50 = arith.constant 0.000000e+00 : f32
    %142 = vector.shape_cast %6 : vector<1x256xi1> to vector<1x256xi1>
    %143 = vector.broadcast %142 : vector<1x256xi1> to vector<4x256xi1>
    %144 = vector.broadcast %cst_50 : f32 to vector<4x256xf32>
    %145 = arith.select %143, %141, %144 : vector<4x256xi1>, vector<4x256xf32>
    %c239_i32_51 = arith.constant 239 : i32
    %146 = tpu.dynamic_rotate %110 by %c239_i32_51 dim 1 : vector<4x256xf32>, i32 -> vector<4x256xf32>
    %cst_52 = arith.constant 0.000000e+00 : f32
    %147 = vector.shape_cast %14 : vector<1x256xi1> to vector<1x256xi1>
    %148 = vector.broadcast %147 : vector<1x256xi1> to vector<4x256xi1>
    %149 = vector.broadcast %cst_52 : f32 to vector<4x256xf32>
    %150 = arith.select %148, %146, %149 : vector<4x256xi1>, vector<4x256xf32>
    %151 = tpu.concatenate %115, %120, %125, %130, %110, %135, %140, %145, %150 in 0 : vector<4x256xf32>, vector<4x256xf32>, vector<4x256xf32>, vector<4x256xf32>, vector<4x256xf32>, vector<4x256xf32>, vector<4x256xf32>, vector<4x256xf32>, vector<4x256xf32> -> vector<36x256xf32>
    %152 = vector.extract_strided_slice %109 {offsets = [0, 256], sizes = [4, 256], strides = [1, 1]} : vector<4x512xf32> to vector<4x256xf32>
    %c17_i32_53 = arith.constant 17 : i32
    %153 = tpu.dynamic_rotate %152 by %c17_i32_53 dim 1 : vector<4x256xf32>, i32 -> vector<4x256xf32>
    %cst_54 = arith.constant 0.000000e+00 : f32
    %154 = vector.shape_cast %11 : vector<1x256xi1> to vector<1x256xi1>
    %155 = vector.broadcast %154 : vector<1x256xi1> to vector<4x256xi1>
    %156 = vector.broadcast %cst_54 : f32 to vector<4x256xf32>
    %157 = arith.select %155, %153, %156 : vector<4x256xi1>, vector<4x256xf32>
    %c16_i32_55 = arith.constant 16 : i32
    %158 = tpu.dynamic_rotate %152 by %c16_i32_55 dim 1 : vector<4x256xf32>, i32 -> vector<4x256xf32>
    %cst_56 = arith.constant 0.000000e+00 : f32
    %159 = vector.shape_cast %4 : vector<1x256xi1> to vector<1x256xi1>
    %160 = vector.broadcast %159 : vector<1x256xi1> to vector<4x256xi1>
    %161 = vector.broadcast %cst_56 : f32 to vector<4x256xf32>
    %162 = arith.select %160, %158, %161 : vector<4x256xi1>, vector<4x256xf32>
    %c15_i32_57 = arith.constant 15 : i32
    %163 = tpu.dynamic_rotate %152 by %c15_i32_57 dim 1 : vector<4x256xf32>, i32 -> vector<4x256xf32>
    %cst_58 = arith.constant 0.000000e+00 : f32
    %164 = vector.shape_cast %12 : vector<1x256xi1> to vector<1x256xi1>
    %165 = vector.broadcast %164 : vector<1x256xi1> to vector<4x256xi1>
    %166 = vector.broadcast %cst_58 : f32 to vector<4x256xf32>
    %167 = arith.select %165, %163, %166 : vector<4x256xi1>, vector<4x256xf32>
    %c1_i32_59 = arith.constant 1 : i32
    %168 = tpu.dynamic_rotate %152 by %c1_i32_59 dim 1 : vector<4x256xf32>, i32 -> vector<4x256xf32>
    %cst_60 = arith.constant 0.000000e+00 : f32
    %169 = vector.shape_cast %8 : vector<1x256xi1> to vector<1x256xi1>
    %170 = vector.broadcast %169 : vector<1x256xi1> to vector<4x256xi1>
    %171 = vector.broadcast %cst_60 : f32 to vector<4x256xf32>
    %172 = arith.select %170, %168, %171 : vector<4x256xi1>, vector<4x256xf32>
    %c255_i32_61 = arith.constant 255 : i32
    %173 = tpu.dynamic_rotate %152 by %c255_i32_61 dim 1 : vector<4x256xf32>, i32 -> vector<4x256xf32>
    %cst_62 = arith.constant 0.000000e+00 : f32
    %174 = vector.shape_cast %10 : vector<1x256xi1> to vector<1x256xi1>
    %175 = vector.broadcast %174 : vector<1x256xi1> to vector<4x256xi1>
    %176 = vector.broadcast %cst_62 : f32 to vector<4x256xf32>
    %177 = arith.select %175, %173, %176 : vector<4x256xi1>, vector<4x256xf32>
    %c241_i32_63 = arith.constant 241 : i32
    %178 = tpu.dynamic_rotate %152 by %c241_i32_63 dim 1 : vector<4x256xf32>, i32 -> vector<4x256xf32>
    %cst_64 = arith.constant 0.000000e+00 : f32
    %179 = vector.shape_cast %13 : vector<1x256xi1> to vector<1x256xi1>
    %180 = vector.broadcast %179 : vector<1x256xi1> to vector<4x256xi1>
    %181 = vector.broadcast %cst_64 : f32 to vector<4x256xf32>
    %182 = arith.select %180, %178, %181 : vector<4x256xi1>, vector<4x256xf32>
    %c240_i32_65 = arith.constant 240 : i32
    %183 = tpu.dynamic_rotate %152 by %c240_i32_65 dim 1 : vector<4x256xf32>, i32 -> vector<4x256xf32>
    %cst_66 = arith.constant 0.000000e+00 : f32
    %184 = vector.shape_cast %6 : vector<1x256xi1> to vector<1x256xi1>
    %185 = vector.broadcast %184 : vector<1x256xi1> to vector<4x256xi1>
    %186 = vector.broadcast %cst_66 : f32 to vector<4x256xf32>
    %187 = arith.select %185, %183, %186 : vector<4x256xi1>, vector<4x256xf32>
    %c239_i32_67 = arith.constant 239 : i32
    %188 = tpu.dynamic_rotate %152 by %c239_i32_67 dim 1 : vector<4x256xf32>, i32 -> vector<4x256xf32>
    %cst_68 = arith.constant 0.000000e+00 : f32
    %189 = vector.shape_cast %14 : vector<1x256xi1> to vector<1x256xi1>
    %190 = vector.broadcast %189 : vector<1x256xi1> to vector<4x256xi1>
    %191 = vector.broadcast %cst_68 : f32 to vector<4x256xf32>
    %192 = arith.select %190, %188, %191 : vector<4x256xi1>, vector<4x256xf32>
    %193 = tpu.concatenate %157, %162, %167, %172, %152, %177, %182, %187, %192 in 0 : vector<4x256xf32>, vector<4x256xf32>, vector<4x256xf32>, vector<4x256xf32>, vector<4x256xf32>, vector<4x256xf32>, vector<4x256xf32>, vector<4x256xf32>, vector<4x256xf32> -> vector<36x256xf32>
    %194 = tpu.concatenate %151, %193 in 1 : vector<36x256xf32>, vector<36x256xf32> -> vector<36x512xf32>
    %195 = arith.truncf %194 : vector<36x512xf32> to vector<36x512xbf16>
    %c0_69 = arith.constant 0 : index
    %c0_70 = arith.constant 0 : index
    %196 = vector.load %arg4[%c0_69, %c0_70] : memref<4x36xbf16, #tpu.memory_space<vmem>>, vector<4x36xbf16>
    %cst_71 = arith.constant dense<0.000000e+00> : vector<4x512xf32>
    %197 = tpu.matmul %196, %195, %cst_71 {dimension_numbers = #tpu.dot_dimension_numbers<[1], [0], [0], [1], [0, 0, 1, 1], [], []>} : vector<4x36xbf16>, vector<36x512xbf16>, vector<4x512xf32> -> vector<4x512xf32>
    %c0_72 = arith.constant 0 : index
    %c0_73 = arith.constant 0 : index
    %198 = vector.load %arg5[%c0_72, %c0_73] : memref<4x1xf32, #tpu.memory_space<vmem>>, vector<4x1xf32>
    %199 = vector.broadcast %198 : vector<4x1xf32> to vector<4x512xf32>
    %200 = arith.addf %197, %199 : vector<4x512xf32>
    %201 = vector.extract_strided_slice %200 {offsets = [0, 0], sizes = [4, 256], strides = [1, 1]} : vector<4x512xf32> to vector<4x256xf32>
    %c0_74 = arith.constant 0 : index
    %c0_75 = arith.constant 0 : index
    %c0_76 = arith.constant 0 : index
    %202 = vector.load %arg1[%c0_74, %c0_75, %c0_76] : memref<2x4x256xf32, #tpu.memory_space<vmem>>, vector<1x4x256xf32>
    %203 = vector.shape_cast %202 : vector<1x4x256xf32> to vector<4x256xf32>
    %204 = arith.addf %201, %203 : vector<4x256xf32>
    %cst_77 = arith.constant 0.000000e+00 : f32
    %205 = vector.broadcast %cst_77 : f32 to vector<4x256xf32>
    %206 = arith.maximumf %204, %205 : vector<4x256xf32>
    %c0_78 = arith.constant 0 : index
    %c0_79 = arith.constant 0 : index
    %c0_80 = arith.constant 0 : index
    %207 = vector.load %arg6[%c0_78, %c0_79, %c0_80] : memref<2x4x256xf32, #tpu.memory_space<vmem>>, vector<1x4x256xf32>
    %208 = vector.shape_cast %207 : vector<1x4x256xf32> to vector<4x256xf32>
    %209 = vector.shape_cast %206 : vector<4x256xf32> to vector<1x4x256xf32>
    tpu.vector_store %arg6[%c0_78, %c0_79, %c0_80], %209 {strides = array<i32>} : memref<2x4x256xf32, #tpu.memory_space<vmem>>, vector<1x4x256xf32>,
    %210 = vector.extract_strided_slice %200 {offsets = [0, 256], sizes = [4, 256], strides = [1, 1]} : vector<4x512xf32> to vector<4x256xf32>
    %c1_81 = arith.constant 1 : index
    %c0_82 = arith.constant 0 : index
    %c0_83 = arith.constant 0 : index
    %211 = vector.load %arg1[%c1_81, %c0_82, %c0_83] : memref<2x4x256xf32, #tpu.memory_space<vmem>>, vector<1x4x256xf32>
    %212 = vector.shape_cast %211 : vector<1x4x256xf32> to vector<4x256xf32>
    %213 = arith.addf %210, %212 : vector<4x256xf32>
    %cst_84 = arith.constant 0.000000e+00 : f32
    %214 = vector.broadcast %cst_84 : f32 to vector<4x256xf32>
    %215 = arith.maximumf %213, %214 : vector<4x256xf32>
    %c1_85 = arith.constant 1 : index
    %c0_86 = arith.constant 0 : index
    %c0_87 = arith.constant 0 : index
    %216 = vector.load %arg6[%c1_85, %c0_86, %c0_87] : memref<2x4x256xf32, #tpu.memory_space<vmem>>, vector<1x4x256xf32>
    %217 = vector.shape_cast %216 : vector<1x4x256xf32> to vector<4x256xf32>
    %218 = vector.shape_cast %215 : vector<4x256xf32> to vector<1x4x256xf32>
    tpu.vector_store %arg6[%c1_85, %c0_86, %c0_87], %218 {strides = array<i32>} : memref<2x4x256xf32, #tpu.memory_space<vmem>>, vector<1x4x256xf32>,
    return
  }
  func.func @transform_0(%arg0: i32) -> (i32, i32, i32) {
    %c0_i32 = arith.constant 0 : i32
    %c0_i32_0 = arith.constant 0 : i32
    %c0_i32_1 = arith.constant 0 : i32
    return %arg0, %c0_i32, %c0_i32_0 : i32, i32, i32
  }
  func.func @transform_1(%arg0: i32) -> (i32, i32) {
    %c0_i32 = arith.constant 0 : i32
    %c0_i32_0 = arith.constant 0 : i32
    %c0_i32_1 = arith.constant 0 : i32
    return %c0_i32, %c0_i32_0 : i32, i32
  }
  func.func @transform_2(%arg0: i32) -> (i32, i32) {
    %c0_i32 = arith.constant 0 : i32
    %c0_i32_0 = arith.constant 0 : i32
    %c0_i32_1 = arith.constant 0 : i32
    return %c0_i32, %c0_i32_0 : i32, i32
  }
  func.func @transform_3(%arg0: i32) -> (i32, i32) {
    %c0_i32 = arith.constant 0 : i32
    %c0_i32_0 = arith.constant 0 : i32
    %c0_i32_1 = arith.constant 0 : i32
    return %c0_i32, %c0_i32_0 : i32, i32
  }
  func.func @transform_4(%arg0: i32) -> (i32, i32) {
    %c0_i32 = arith.constant 0 : i32
    %c0_i32_0 = arith.constant 0 : i32
    %c0_i32_1 = arith.constant 0 : i32
    return %c0_i32, %c0_i32_0 : i32, i32
  }
  func.func @transform_5(%arg0: i32) -> (i32, i32, i32) {
    %c0_i32 = arith.constant 0 : i32
    %c0_i32_0 = arith.constant 0 : i32
    %c0_i32_1 = arith.constant 0 : i32
    return %arg0, %c0_i32, %c0_i32_0 : i32, i32, i32
  }
}

</mosaic_0001>

<bundles_post_ra>
// kernel: tpu_custom_call.1
= control target key start
LH: loop header
LB: loop body
LE: loop exit
PB: predicated region body
PF: predicated region fallthrough
CT: control target
= control target key end

     0   :  { %10 = vsyncpa [#allocation3], 0  ;;  %s2090_s0 = inlined_call_operand.hbm [shape: f32[4,4,256], index: 0, kind: input, shape index: {}]   ;;  %s2091_s1 = inlined_call_operand.vmem [shape: bf16[4,36], index: 1, kind: input, shape index: {}]   ;;  %s2092_s2 = inlined_call_operand.vmem [shape: f32[4,1], index: 2, kind: input, shape index: {}]   ;;  %s2093_s3 = inlined_call_operand.vmem [shape: bf16[4,36], index: 3, kind: input, shape index: {}]   ;;  %s2094_s4 = inlined_call_operand.vmem [shape: f32[4,1], index: 4, kind: input, shape index: {}]   ;;  %s2095_s5 = inlined_call_operand.hbm [shape: f32[4,4,256], index: 5, kind: output, shape index: {}]  }
   0x1   :  { %12 = vsyncpa [#allocation3 + $0x1], 0 }
   0x2   :  { %13 = vsyncpa [#allocation4], 0 }
   0x3   :  { %15 = vsyncpa [#allocation4 + $0x1], 0  ;;  %s1447_s18 = smov 0   ;;  %s1449_s19 = smov 0  }
   0x4   :  { %s1451_s20 = smov 0   ;;  %s1453_s21 = smov 0  }
   0x5 LB: > { %s1468_s22 = sadd.s32 4294967295, %s1400_s21   ;;  %s1051_s23 = sadd.s32 4294967294, %s1400_s21   ;;  %s1400_s21 = sphi %s1453_s21, %s2147_s21   ;;  %s1396_s20 = sphi %s1451_s20, %s2146_s20   ;;  %s1392_s19 = sphi %s1449_s19, %s2145_s19   ;;  %s1388_s18 = sphi %s1447_s18, %s2144_s18  }
   0x6   : > { %s1472_s24 = sadd.s32 1, %s1400_s21   ;;  %s28_s25 = sadd.s32 1, %s1396_s20 }
   0x7   : > { %s25_s26 = ssub.s32 %s1400_s21, %s1472_s24  ;;  %p35_p0 = scmp.ne.s32.totalorder %s1396_s20, %s1392_s19 }
   0x8   : > { %p26_p1 = scmp.eq.s32.totalorder %s25_s26, 0  ;;  %p36_p2 = scmp.eq.s32.totalorder %s1400_s21, 0 }
   0x9   : > { %p41_p3 = scmp.ne.s32.totalorder %s1392_s19, %s1388_s18  ;;  %p42_p4 = scmp.eq.s32.totalorder %s1468_s22, 0 }
   0xa   : > { %s1484_s27 = scalar_select %p26_p1, %s1396_s20, %s28_s25  }
   0xb   : > { %p1486_p5 = por %p36_p2, %p35_p0  ;;  %p1490_p6 = por %p42_p4, %p41_p3 }
   0xc   : > { %p149_p7 = scmp.eq.s32.totalorder %s1468_s22, 1  ;;  %p155_p8 = scmp.eq.s32.totalorder %s1051_s23, 1 }
   0xd   : > { %p1094_p10 = scmp.lt.s32.totalorder %s1400_s21, 2  ;;  %s187_s7 = sand.u32 1, %s1396_s20  }
   0xe   : > { %p1497_p11 = por %p149_p7, %p35_p0  ;;  %p1501_p12 = por %p155_p8, %p41_p3 }
   0xf   : > { %s1079_s8 = sshll.u32 %s1400_s21, 8  ;;  %s1054_s9 = sshll.u32 %s187_s7, 4 }
  0x10   : > { %s2104_s30 = scalar_select %p1497_p11, 1, 0 }
  0x11   : > { %s2105_s6 = scalar_select %p1501_p12, 1, 0 }
  0x12   : > { %s1510_s12 = scalar_lea.hbm %s2090_s0, %s1079_s8  ;;  %s191_s13 = scalar_lea.vmem [#allocation2], %s1054_s9 }
  0x13   : > { %s199_s14 = sshll.u32 %s191_s13, 4  ;;  %p1514_p13 = pnand %p1094_p10, %p1486_p5  ;;  %s1518_s14 = int_to_ptr.vmem [resolvable:$true] %s199_s14 }
  0x14   : > { %s1520_s16 = scalar_lea.sflag [#allocation3], %s187_s7  ;;  %s1304_s17 = scalar_lea.hbm %s1510_s12, 256 }
  0x15   : > { %p1305_p0 = scmp.ne.s32.totalorder %s1510_s12, %s1304_s17  ;;  %p1306_p1 = pneg %p1514_p13 }
  0x16   : > { %s1309_s26 = scalar_lea.hbm %s2090_s0, 512  ;;  %p1310_p4 = scmp.lt.u32.totalorder %s1510_s12, %s2090_s0 }
  0x17   : > { %p1307_p2 = pnand %p1306_p1, %p1305_p0  ;;  %p1311_p5 = scmp.lt.u32.totalorder %s1309_s26, %s1304_s17 }
  0x18   : > { %p1313_p8 = scmp.lt.u32.totalorder %s1304_s17, %s1510_s12 }
  0x19   : > { %p1308_p3 = pneg %p1307_p2  ;;  %p1312_p7 = por %p1311_p5, %p1310_p4 }
  0x1b   : > { %p1314_p10 = por %p1313_p8, %p1312_p7 }
  0x1d   : > { %p1315_p9 = pnand %p1314_p10, %p1308_p3 }
  0x1f   : > { %1318 = shalt.err (!%p1315_p9)
}
  0x20   : > { %s1319_s7 = scalar_lea.vmem %s1518_s14, 256  ;;  %s1402_s9 = smov [#allocation2]  }
  0x21   : > { %p1320_p0 = scmp.ne.s32.totalorder %s1518_s14, %s1319_s7  ;;  %s1324_s10 = sshll.u32 %s1402_s9, 4  ;;  %s1325_s10 = int_to_ptr.vmem [resolvable:$false] %s1324_s10 }
  0x22   : > { %s1326_s11 = scalar_lea.vmem %s1325_s10, 512  ;;  %p1327_p11 = scmp.lt.s32.totalorder %s1518_s14, %s1325_s10 }
  0x23   : > { %p1322_p2 = pnand %p1320_p0, %p1306_p1  ;;  %p1328_p4 = scmp.lt.s32.totalorder %s1326_s11, %s1319_s7 }
  0x25   : > { %p1323_p12 = pneg %p1322_p2  ;;  %p1329_p5 = por %p1328_p4, %p1327_p11 }
  0x27   : > { %p1330_p7 = pnand %p1329_p5, %p1323_p12 }
  0x29   : > { %1333 = shalt.err (!%p1330_p7)
}
  0x2a   : > { %s1403_s13 = smov 128   ;;  %s1404_s17 = smov 8  }
  0x2b   : > { %1089 = dma.hbm_to_vmem [thread:$0]  (!%p1514_p13), %s1510_s12, 256, %s1518_s14, %s1520_s16, %s1403_s13, %s1403_s13, %s1404_s17  }
  0x2c   : > { %p1058_p9 = scmp.ge.s32.totalorder %s1400_s21, 1  ;;  %p207_p1 = scmp.lt.s32.totalorder %s1400_s21, 3 }
  0x2e   : > { %p208_p3 = pnand %p1058_p9, %p207_p1 }
  0x2f   : > { %s1551_s23 = sand.u32 (!%p208_p3), 1, %s1392_s19  }
  0x30   : > { %211 = sbr.rel (%p208_p3) target bundleno = 835 (0x343), region = 40  ;;  %s1059_s25 = sshll.u32 (!%p208_p3), %s1551_s23, 4 }
  0x31   : > { %s214_s26 = scalar_lea.sflag (!%p208_p3), [#allocation3], %s1551_s23  ;;  %s217_s28 = scalar_lea.vmem (!%p208_p3), [#allocation2], %s1059_s25 }
  0x37   : > { %1379 = dma.done.wait (%p1490_p6), %s214_s26, 256  }
  0x38   : > { %1381 = vsyncadd (%p1490_p6), %s214_s26, 4294967040  ;;  %v1561_v0 = vld [vmem:[%s217_s28] sm:$0xff]  ;;  %v1563_v1 = vld [vmem:[%s217_s28 + $0x8] sm:$0xff]  ;;  %s1405_s12 = smov 16   ;;  %s1406_s29 = smov 1   ;;  %v1413_v6 = vmov 0   ;;  %v247_v8 = vlaneseq }
  0x39   : > { %v1567_v2 = vcombine.high %v1561_v0, %v1561_v0  ;;  %v1571_v3 = vcombine.high %v1563_v1, %v1563_v1  ;;  %s1407_s14 = smov 15   ;;  %s1408_s15 = smov 17   ;;  %578 = vmatprep.mubr.bf16.mxu0 %v1413_v6  ;;  %619 = vmatprep.mubr.bf16.mxu1 %v1413_v6  ;;  %v523_v7 = vld [vmem:[%s2092_s2] sm:$0xf]  ;;  %vm400_vm9 = vcmask 1043456  }
  0x3a   : > { %s1409_s16 = smov 112   ;;  %s1410_s8 = smov 127   ;;  %1221 = vset.pattern.permute.xlu0 %v1413_v6  ;;  %v1599_v9 = vand.u32 127, %v247_v8 }
  0x3b   : > { %v1151_v4 = vpack.i.bf16 %v1567_v2, %v1561_v0  ;;  %v1156_v5 = vpack.i.bf16 %v1571_v3, %v1563_v1  ;;  %s1411_s7 = smov 113   ;;  %s1412_s9 = smov 111  }
  0x3c   : > { %v1602_v10 = vadd.s32 128, %v1599_v9  ;;  %v250_v12 = vand.u32 15, %v1599_v9  ;;  %vm289_vm0 = vcmp.lt.s32.totalorder %v1599_v9, 16  ;;  %vm315_vm1 = vcmp.lt.s32.totalorder %v1599_v9, 1  ;;  %p2141_p11 = scmp.ne.s32.totalorder %s2104_s30, 0 }
  0x3d   : > { %1152 = vrot.lane.b32.xlu1 %v1151_v4, %s1405_s12  ;;  %1142 = vrot.lane.b32.xlu0 %v1151_v4, %s1406_s29  ;;  %vm252_vm3 = vcmp.ge.s32.totalorder %v1599_v9, 16  ;;  %vm276_vm7 = vcmp.lt.s32.totalorder %v1599_v9, 17  ;;  %vm2097_vm8 = vcmp.lt.s32.totalorder %v1599_v9, 15  ;;  %vm2098_vm10 = vcmp.lt.s32.totalorder %v1599_v9, 112 }
  0x3e   : > { %v251_v11 = vand.u32 15, %v1602_v10  ;;  %vm1613_vm4 = vcmp.ne.s32.totalorder %v250_v12, 0  ;;  %vm1617_vm5 = vcmp.ne.s32.totalorder %v250_v12, 15  ;;  %vm2099_vm11 = vcmp.lt.s32.totalorder %v1599_v9, 127 }
  0x3f   : > { %vm1657_vm12 = vmand %vm252_vm3, %vm1613_vm4  ;;  %vm2100_vm13 = vcmp.lt.s32.totalorder %v1602_v10, 240  ;;  %vm341_vm15 = vcmp.lt.s32.totalorder %v1599_v9, 113 }
  0x40   : > { %vm1608_vm2 = vcmp.ne.s32.totalorder %v251_v11, 0  ;;  %vm1629_vm6 = vcmp.ne.s32.totalorder %v251_v11, 15  ;;  %vm1668_vm14 = vmand %vm252_vm3, %vm1617_vm5 }
  0x41   : > { %1157 = vrot.lane.b32.xlu1 %v1156_v5, %s1405_s12  ;;  %1147 = vrot.lane.b32.xlu0 %v1156_v5, %s1406_s29 }
  0x45   : > { %1167 = vrot.lane.b32.xlu1 %v1151_v4, %s1407_s14  ;;  %1162 = vrot.lane.b32.xlu0 %v1151_v4, %s1408_s15 }
  0x49   : > { %1177 = vrot.lane.b32.xlu1 %v1156_v5, %s1407_s14  ;;  %1172 = vrot.lane.b32.xlu0 %v1156_v5, %s1408_s15 }
  0x4d   : > { %1187 = vrot.lane.b32.xlu1 %v1151_v4, %s1409_s16  ;;  %1182 = vrot.lane.b32.xlu0 %v1151_v4, %s1410_s8 }
  0x51   : > { %1197 = vrot.lane.b32.xlu1 %v1156_v5, %s1409_s16  ;;  %1192 = vrot.lane.b32.xlu0 %v1156_v5, %s1410_s8 }
  0x55   : > { %1207 = vrot.lane.b32.xlu1 %v1156_v5, %s1411_s7  ;;  %1202 = vrot.lane.b32.xlu0 %v1151_v4, %s1411_s7 }
  0x59   : > { %1217 = vrot.lane.b32.xlu1 %v1156_v5, %s1412_s9  ;;  %1212 = vrot.lane.b32.xlu0 %v1151_v4, %s1412_s9 }
  0x5d   : > { %526 = vperm.xlu0 %1221, %v523_v7  }
  0xaf   : > { %v1153_v13 = vpop.permute.xlu1 %1152  ;;  %v1143_v14 = vpop.permute.xlu0 %1142 }
  0xb0   : > { %v1155_v17 = vunpack.i.h.bf16 %v1153_v13  ;;  %v1154_v18 = vunpack.i.l.bf16 %v1153_v13  ;;  %v1145_v19 = vunpack.i.h.bf16 %v1143_v14  ;;  %v1144_v20 = vunpack.i.l.bf16 %v1143_v14 }
  0xb2   : > { %v291_v22 = vsel %vm289_vm0, %v1155_v17, %v1154_v18  ;;  %v316_v23 = vsel %vm315_vm1, %v1144_v20, %v1145_v19  ;;  %v317_v24 = vsel %vm315_vm1, %v1145_v19, %v1144_v20  ;;  %v290_v25 = vsel %vm289_vm0, %v1154_v18, %v1155_v17 }
  0xb3   : > { %v1158_v26 = vpop.permute.xlu1 %1157  ;;  %v1148_v27 = vpop.permute.xlu0 %1147  ;;  %v323_v29 = vsel %vm1608_vm2, %v316_v23, 0.0  ;;  %v296_v30 = vsel %vm252_vm3, %v291_v22, 0.0  ;;  %v322_v31 = vsel %vm1613_vm4, %v317_v24, 0.0  ;;  %v379_v36 = vrot.slane %v290_v25, 4 }
  0xb4   : > { %v1160_v32 = vunpack.i.h.bf16 %v1158_v26  ;;  %v1159_v33 = vunpack.i.l.bf16 %v1158_v26  ;;  %v1150_v34 = vunpack.i.h.bf16 %v1148_v27  ;;  %v1149_v35 = vunpack.i.l.bf16 %v1148_v27 }
  0xb5   : > { %v385_v43 = vrot.slane %v323_v29, 4  ;;  %v378_v45 = vrot.slane %v296_v30, 4  ;;  %v384_v46 = vrot.slane %v322_v31, 4 }
  0xb6   : > { %v427_v37 = vsel %vm289_vm0, %v1160_v32, %v1159_v33  ;;  %v442_v38 = vsel %vm315_vm1, %v1149_v35, %v1150_v34  ;;  %v1647_v39 = vsel %vm315_vm1, %v1150_v34, %v1149_v35  ;;  %v426_v40 = vsel %vm289_vm0, %v1159_v33, %v1160_v32 }
  0xb7   : > { %v1168_v41 = vpop.permute.xlu1 %1167  ;;  %v1163_v42 = vpop.permute.xlu0 %1162  ;;  %v445_v47 = vsel %vm1608_vm2, %v442_v38, 0.0  ;;  %v481_v53 = vrot.slane %v426_v40, 4  ;;  %v1674_v55 = vsel %vm252_vm3, %v427_v37, 0.0  ;;  %v444_v56 = vsel %vm1613_vm4, %v1647_v39, 0.0 }
  0xb8   : > { %v1170_v48 = vunpack.i.h.bf16 %v1168_v41  ;;  %v1169_v49 = vunpack.i.l.bf16 %v1168_v41  ;;  %v1165_v50 = vunpack.i.h.bf16 %v1163_v42  ;;  %v1164_v51 = vunpack.i.l.bf16 %v1163_v42 }
  0xb9   : > { %v487_v54 = vrot.slane %v445_v47, 4  ;;  %v480_v39 = vrot.slane %v1674_v55, 4  ;;  %v486_v55 = vrot.slane %v444_v56, 4 }
  0xba   : > { %v277_v57 = vsel %vm276_vm7, %v1164_v51, %v1165_v50  ;;  %v303_v58 = vsel %vm2097_vm8, %v1169_v49, %v1170_v48  ;;  %v278_v59 = vsel %vm276_vm7, %v1165_v50, %v1164_v51  ;;  %v304_v60 = vsel %vm2097_vm8, %v1170_v48, %v1169_v49 }
  0xbb   : > { %v1178_v61 = vpop.permute.xlu1 %1177  ;;  %v1173_v62 = vpop.permute.xlu0 %1172  ;;  %v284_v63 = vsel %vm1608_vm2, %v277_v57, 0.0  ;;  %v310_v4 = vsel %vm1629_vm6, %v303_v58, 0.0  ;;  %v283_v5 = vsel %vm1657_vm12, %v278_v59, 0.0  ;;  %v309_v7 = vsel %vm1668_vm14, %v304_v60, 0.0 }
  0xbc   : > { %v1180_v8 = vunpack.i.h.bf16 %v1178_v61  ;;  %v1179_v11 = vunpack.i.l.bf16 %v1178_v61  ;;  %v1175_v12 = vunpack.i.h.bf16 %v1173_v62  ;;  %v1174_v13 = vunpack.i.l.bf16 %v1173_v62 }
  0xbd   : > { %v402_v14 = vsel %vm400_vm9, %v284_v63, %v379_v36  ;;  %v404_v17 = vsel %vm400_vm9, %v310_v4, %v385_v43  ;;  %v401_v18 = vsel %vm400_vm9, %v283_v5, %v378_v45  ;;  %v403_v19 = vsel %vm400_vm9, %v309_v7, %v384_v46 }
  0xbe   : > { %v511_v20 = vpack.c.bf16 %v404_v17, %v402_v14  ;;  %v510_v22 = vpack.c.bf16 %v403_v19, %v401_v18  ;;  %v418_v23 = vsel %vm276_vm7, %v1174_v13, %v1175_v12  ;;  %v434_v24 = vsel %vm2097_vm8, %v1179_v11, %v1180_v8 }
  0xbf   : > { %v1188_v25 = vpop.permute.xlu1 %1187  ;;  %v1183_v26 = vpop.permute.xlu0 %1182  ;;  %v421_v27 = vsel %vm1608_vm2, %v418_v23, 0.0  ;;  %v437_v29 = vsel %vm1629_vm6, %v434_v24, 0.0  ;;  %v419_v30 = vsel %vm276_vm7, %v1175_v12, %v1174_v13  ;;  %v435_v31 = vsel %vm2097_vm8, %v1180_v8, %v1179_v11 }
  0xc0   : > { %v1190_v32 = vunpack.i.h.bf16 %v1188_v25  ;;  %v1189_v33 = vunpack.i.l.bf16 %v1188_v25  ;;  %v1185_v34 = vunpack.i.h.bf16 %v1183_v26  ;;  %v1184_v35 = vunpack.i.l.bf16 %v1183_v26  ;;  %546 = vmatprep.subr.bf16.mxu0 %v511_v20 }
  0xc1   : > { %547 = vmatpush1.bf16.msra.mxu0 %v510_v22  ;;  %v503_v36 = vsel %vm400_vm9, %v421_v27, %v481_v53  ;;  %v505_v37 = vsel %vm400_vm9, %v437_v29, %v487_v54  ;;  %v420_v38 = vsel %vm1657_vm12, %v419_v30, 0.0  ;;  %v436_v43 = vsel %vm1668_vm14, %v435_v31, 0.0 }
  0xc2   : > { %v356_v40 = vsel %vm2098_vm10, %v1190_v32, %v1189_v33  ;;  %v329_v41 = vsel %vm2099_vm11, %v1184_v35, %v1185_v34  ;;  %v330_v42 = vsel %vm2099_vm11, %v1185_v34, %v1184_v35  ;;  %v1727_v45 = vsel %vm2098_vm10, %v1189_v33, %v1190_v32 }
  0xc3   : > { %v362_v46 = vsel %vm2100_vm13, %v356_v40, 0.0  ;;  %v335_v47 = vsel %vm1617_vm5, %v329_v41, 0.0  ;;  %v336_v48 = vsel %vm1629_vm6, %v330_v42, 0.0  ;;  %v1198_v49 = vpop.permute.xlu1 %1197  ;;  %v1193_v50 = vpop.permute.xlu0 %1192  ;;  %vm2101_vm8 = vcmp.lt.s32.totalorder %v1599_v9, 111 }
  0xc4   : > { %v390_v51 = vrot.slane %v335_v47, 4  ;;  %v391_v53 = vrot.slane %v336_v48, 4  ;;  %v1200_v54 = vunpack.i.h.bf16 %v1198_v49  ;;  %v1199_v57 = vunpack.i.l.bf16 %v1198_v49 }
  0xc5   : > { %v1195_v58 = vunpack.i.h.bf16 %v1193_v50  ;;  %v1194_v59 = vunpack.i.l.bf16 %v1193_v50  ;;  %v513_v60 = vpack.c.bf16 %v505_v37, %v503_v36  ;;  %v396_v61 = vrot.slane %v1727_v45, 4 }
  0xc6   : > { %v397_v62 = vrot.slane %v362_v46, 4  ;;  %v502_v63 = vsel %vm400_vm9, %v420_v38, %v480_v39  ;;  %v504_v4 = vsel %vm400_vm9, %v436_v43, %v486_v55  ;;  %v467_v5 = vsel %vm2098_vm10, %v1200_v54, %v1199_v57 }
  0xc7   : > { %v450_v7 = vsel %vm2099_vm11, %v1194_v59, %v1195_v58  ;;  %v451_v56 = vsel %vm2099_vm11, %v1195_v58, %v1194_v59  ;;  %587 = vmatprep.subr.bf16.mxu1 %v513_v60  ;;  %v1208_v8 = vpop.permute.xlu1 %1207  ;;  %v1203_v11 = vpop.permute.xlu0 %1202  ;;  %v406_v12 = vsel %vm400_vm9, %v1567_v2, %v391_v53  ;;  %v466_v13 = vsel %vm2098_vm10, %v1199_v57, %v1200_v54  ;;  %vm1761_vm10 = vmand %vm2100_vm13, %vm1608_vm2 }
  0xc8   : > { %v469_v14 = vsel %vm2100_vm13, %v467_v5, 0.0  ;;  %v452_v17 = vsel %vm1617_vm5, %v450_v7, 0.0  ;;  %v453_v18 = vsel %vm1629_vm6, %v451_v56, 0.0  ;;  %v512_v22 = vpack.c.bf16 %v504_v4, %v502_v63  ;;  %vm1781_vm11 = vmand %vm2100_vm13, %vm1629_vm6 }
  0xc9   : > { %v492_v19 = vrot.slane %v452_v17, 4  ;;  %v493_v20 = vrot.slane %v453_v18, 4  ;;  %v405_v23 = vsel %vm400_vm9, %v1561_v0, %v390_v51  ;;  %v1210_v24 = vunpack.i.h.bf16 %v1208_v8  ;;  %v522_v18 = vld [vmem:[%s2091_s1] sm:$0x3] }
  0xca   : > { %v1209_v25 = vunpack.i.l.bf16 %v1208_v8  ;;  %v1205_v26 = vunpack.i.h.bf16 %v1203_v11  ;;  %v1204_v27 = vunpack.i.l.bf16 %v1203_v11  ;;  %v498_v29 = vrot.slane %v466_v13, 4  ;;  %588 = vmatpush1.bf16.msra.mxu1 %v512_v22 }
  0xcb   : > { %v499_v30 = vrot.slane %v469_v14, 4  ;;  %v1218_v31 = vpop.permute.xlu1 %1217  ;;  %v1213_v32 = vpop.permute.xlu0 %1212  ;;  %v507_v34 = vsel %vm400_vm9, %v1571_v3, %v493_v20  ;;  %v506_v35 = vsel %vm400_vm9, %v1563_v1, %v492_v19  ;;  %vm533_vm13 = vcmask 1041408  }
  0xcc   : > { %v458_v36 = vsel %vm341_vm15, %v1209_v25, %v1210_v24  ;;  %v459_v37 = vsel %vm341_vm15, %v1210_v24, %v1209_v25  ;;  %v342_v38 = vsel %vm341_vm15, %v1204_v27, %v1205_v26  ;;  %v343_v39 = vsel %vm341_vm15, %v1205_v26, %v1204_v27 }
  0xcd   : > { %v1220_v41 = vunpack.i.h.bf16 %v1218_v31  ;;  %v1219_v42 = vunpack.i.l.bf16 %v1218_v31  ;;  %v1215_v43 = vunpack.i.h.bf16 %v1213_v32  ;;  %v1214_v45 = vunpack.i.l.bf16 %v1213_v32 }
  0xce   : > { %v349_v46 = vsel %vm1761_vm10, %v343_v39, 0.0  ;;  %v461_v47 = vsel %vm1761_vm10, %v459_v37, 0.0  ;;  %v348_v48 = vsel %vm1613_vm4, %v342_v38, 0.0  ;;  %v460_v49 = vsel %vm1613_vm4, %v458_v36, 0.0 }
  0xcf   : > { %v475_v50 = vsel %vm2101_vm8, %v1220_v41, %v1219_v42  ;;  %v369_v51 = vsel %vm2101_vm8, %v1215_v43, %v1214_v45  ;;  %v408_v53 = vsel %vm400_vm9, %v349_v46, %v397_v62  ;;  %v509_v54 = vsel %vm400_vm9, %v461_v47, %v499_v30 }
  0xd0   : > { %v477_v55 = vsel %vm1781_vm11, %v475_v50, 0.0  ;;  %v375_v57 = vsel %vm1781_vm11, %v369_v51, 0.0  ;;  %v515_v58 = vpack.c.bf16 %v408_v53, %v406_v12  ;;  %v517_v59 = vpack.c.bf16 %v509_v54, %v507_v34 }
  0xd1   : > { %v407_v60 = vsel %vm400_vm9, %v348_v48, %v396_v61  ;;  %v508_v63 = vsel %vm400_vm9, %v460_v49, %v498_v29  ;;  %v519_v4 = vpack.c.bf16 %v375_v57, %v375_v57  ;;  %v521_v5 = vpack.c.bf16 %v477_v55, %v477_v55 }
  0xd2   : > { %548 = vmatprep.subr.bf16.mxu0 %v515_v58  ;;  %589 = vmatprep.subr.bf16.mxu1 %v517_v59  ;;  %v514_v7 = vpack.c.bf16 %v407_v60, %v405_v23  ;;  %v516_v62 = vpack.c.bf16 %v508_v63, %v506_v35  ;;  %v368_v56 = vsel %vm2101_vm8, %v1214_v45, %v1215_v43 }
  0xd3   : > { %v374_v8 = vsel %vm1617_vm5, %v368_v56, 0.0  ;;  %v474_v11 = vsel %vm2101_vm8, %v1219_v42, %v1220_v41  ;;  %vm529_vm8 = vcmask 293888   ;;  %v837_v41 = vld [vmem:[%s2094_s4] sm:$0xf] }
  0xd4   : > { %549 = vmatpush1.bf16.msra.mxu0 %v514_v7  ;;  %590 = vmatpush1.bf16.msra.mxu1 %v516_v62  ;;  %v518_v61 = vpack.c.bf16 %v374_v8, %v374_v8  ;;  %v476_v12 = vsel %vm1617_vm5, %v474_v11, 0.0 }
  0xd5   : > { %1062 = vmatprep.subr.msk.bf16.mxu0 %vm533_vm13, %v519_v4  ;;  %1064 = vmatprep.subr.msk.bf16.mxu1 %vm533_vm13, %v521_v5  ;;  %v520_v13 = vpack.c.bf16 %v476_v12, %v476_v12 }
  0xd6   : > { %v535_v14 = vsel %vm533_vm13, %v518_v61, 0 }
  0xd7   : > { %v541_v17 = vsel %vm533_vm13, %v520_v13, 0 }
  0xd8   : > { %551 = vmatpush1.bf16.msra.mxu0 %v535_v14  ;;  %592 = vmatpush1.bf16.msra.mxu1 %v541_v17 }
  0xdb   : > { %1063 = vmatmul.mubr.msk.bf16.vlgmr.msra.gmra.mrb[0].mxu0 %vm529_vm8, %v522_v18  ;;  %1065 = vmatmul.mubr.msk.bf16.vlgmr.msra.gmra.mrb[0].mxu1 %vm529_vm8, %v522_v18 }
  0xdc   : > { %890 = vmatprep.mubr.bf16.mxu0 %v1413_v6  ;;  %931 = vmatprep.mubr.bf16.mxu1 %v1413_v6  ;;  %v527_v19 = vpop.permute.xlu0 %526 }
 0x1ae   : > { %v580_v20 = vpop.f32.mrb[0].mxu0  ;;  %v621_v22 = vpop.f32.mrb[0].mxu1 }
 0x1af   : > { %v1824_v23 = vadd.f32 %v580_v20, %v527_v19  ;;  %v582_v24 = vpop.f32.mrb[1].mxu0  ;;  %v623_v25 = vpop.f32.mrb[1].mxu1  ;;  %v1826_v26 = vadd.f32 %v621_v22, %v527_v19 }
 0x1b0   : > { %v1828_v27 = vadd.f32 %v582_v24, %v527_v19  ;;  %v1830_v29 = vadd.f32 %v623_v25, %v527_v19  ;;  %v584_v30 = vpop.f32.mrb[2].mxu0  ;;  %v625_v31 = vpop.f32.mrb[2].mxu1 }
 0x1b1   : > { %v628_v32 = vmax.f32 %v1824_v23, 0.0  ;;  %v585_v34 = vpop.f32.mrb[3].mxu0  ;;  %v626_v35 = vpop.f32.mrb[3].mxu1  ;;  %v630_v36 = vmax.f32 %v1826_v26, 0.0  ;;  %v836_v26 = vld [vmem:[%s2093_s3] sm:$0x3] }
 0x1b2   : > { %v629_v6 = vmax.f32 %v1828_v27, 0.0  ;;  %v631_v37 = vmax.f32 %v1830_v29, 0.0 }
 0x1b4   : > { %v1232_v38 = vpack.i.bf16 %v629_v6, %v628_v32  ;;  %v1227_v39 = vpack.i.bf16 %v631_v37, %v630_v36 }
 0x1b6   : > { %1233 = vrot.lane.b32.xlu0 %v1232_v38, %s1405_s12  ;;  %1223 = vrot.lane.b32.xlu1 %v1232_v38, %s1406_s29 }
 0x1ba   : > { %1243 = vrot.lane.b32.xlu0 %v1232_v38, %s1408_s15  ;;  %1228 = vrot.lane.b32.xlu1 %v1227_v39, %s1406_s29 }
 0x1be   : > { %1253 = vrot.lane.b32.xlu0 %v1227_v39, %s1408_s15  ;;  %1238 = vrot.lane.b32.xlu1 %v1227_v39, %s1405_s12 }
 0x1c2   : > { %1263 = vrot.lane.b32.xlu0 %v1232_v38, %s1410_s8  ;;  %1248 = vrot.lane.b32.xlu1 %v1232_v38, %s1407_s14 }
 0x1c6   : > { %1273 = vrot.lane.b32.xlu0 %v1227_v39, %s1410_s8  ;;  %1258 = vrot.lane.b32.xlu1 %v1227_v39, %s1407_s14  ;;  %s243_s14 = scalar_lea.vmem [#allocation5], %s1059_s25 }
 0x1c7   : > { %s978_s15 = sshll.u32 %s243_s14, 4  ;;  %s2041_s15 = int_to_ptr.vmem [resolvable:$true] %s978_s15 }
 0x1c8   : > { %s1334_s10 = scalar_lea.vmem %s2041_s15, 256 }
 0x1c9   : > { %p1335_p6 = scmp.ne.s32.totalorder %s2041_s15, %s1334_s10 }
 0x1ca   : > { %1283 = vrot.lane.b32.xlu0 %v1232_v38, %s1411_s7  ;;  %1268 = vrot.lane.b32.xlu1 %v1232_v38, %s1409_s16 }
 0x1cb   : > { %p1336_p12 = pnand %p1335_p6, %p2141_p11 }
 0x1cd   : > { %p1337_p13 = pneg %p1336_p12 }
 0x1ce   : > { %1293 = vrot.lane.b32.xlu0 %v1232_v38, %s1412_s9  ;;  %1278 = vrot.lane.b32.xlu1 %v1227_v39, %s1409_s16  ;;  %s1081_s16 = sshll.u32 %s1468_s22, 8  ;;  %s1414_s22 = smov [#allocation5]  }
 0x1cf   : > { %s2046_s25 = scalar_lea.hbm %s2095_s5, %s1081_s16  ;;  %s1338_s11 = sshll.u32 %s1414_s22, 4  ;;  %s1339_s11 = int_to_ptr.vmem [resolvable:$false] %s1338_s11 }
 0x1d0   : > { %s1340_s13 = scalar_lea.vmem %s1339_s11, 512  ;;  %p1341_p8 = scmp.lt.s32.totalorder %s2041_s15, %s1339_s11 }
 0x1d1   : > { %p1342_p10 = scmp.lt.s32.totalorder %s1340_s13, %s1334_s10 }
 0x1d2   : > { %840 = vperm.xlu0 %1221, %v837_v41   ;;  %1288 = vrot.lane.b32.xlu1 %v1227_v39, %s1411_s7 }
 0x1d3   : > { %p1343_p0 = por %p1342_p10, %p1341_p8 }
 0x1d5   : > { %p1344_p2 = pnand %p1343_p0, %p1337_p13 }
 0x1d6   : > { %1298 = vrot.lane.b32.xlu1 %v1227_v39, %s1412_s9  ;;  %s964_s9 = scalar_lea.sflag [#allocation4], %s1551_s23 }
 0x228   : > { %v1234_v42 = vpop.permute.xlu0 %1233  ;;  %v1224_v43 = vpop.permute.xlu1 %1223 }
 0x229   : > { %v1236_v45 = vunpack.i.h.bf16 %v1234_v42  ;;  %v1235_v46 = vunpack.i.l.bf16 %v1234_v42  ;;  %v1226_v47 = vunpack.i.h.bf16 %v1224_v43  ;;  %v1225_v48 = vunpack.i.l.bf16 %v1224_v43 }
 0x22b   : > { %v644_v49 = vsel %vm289_vm0, %v1235_v46, %v1236_v45  ;;  %v645_v50 = vsel %vm289_vm0, %v1236_v45, %v1235_v46  ;;  %v661_v51 = vsel %vm315_vm1, %v1226_v47, %v1225_v48  ;;  %v660_v55 = vsel %vm315_vm1, %v1225_v48, %v1226_v47 }
 0x22c   : > { %v1244_v53 = vpop.permute.xlu0 %1243  ;;  %v1229_v54 = vpop.permute.xlu1 %1228  ;;  %v646_v63 = vsel %vm252_vm3, %v645_v50, 0.0  ;;  %v699_v4 = vrot.slane %v644_v49, 4  ;;  %v662_v5 = vsel %vm1613_vm4, %v661_v51, 0.0  ;;  %v663_v7 = vsel %vm1608_vm2, %v660_v55, 0.0 }
 0x22d   : > { %v1246_v57 = vunpack.i.h.bf16 %v1244_v53  ;;  %v1245_v58 = vunpack.i.l.bf16 %v1244_v53  ;;  %v1231_v59 = vunpack.i.h.bf16 %v1229_v54  ;;  %v1230_v60 = vunpack.i.l.bf16 %v1229_v54 }
 0x22e   : > { %v698_v18 = vrot.slane %v646_v63, 4  ;;  %v704_v24 = vrot.slane %v662_v5, 4  ;;  %v705_v25 = vrot.slane %v663_v7, 4 }
 0x22f   : > { %v637_v62 = vsel %vm276_vm7, %v1246_v57, %v1245_v58  ;;  %v756_v56 = vsel %vm315_vm1, %v1230_v60, %v1231_v59  ;;  %v757_v8 = vsel %vm315_vm1, %v1231_v59, %v1230_v60  ;;  %v636_v12 = vsel %vm276_vm7, %v1245_v58, %v1246_v57 }
 0x230   : > { %v1254_v11 = vpop.permute.xlu0 %1253  ;;  %v1239_v61 = vpop.permute.xlu1 %1238  ;;  %v758_v13 = vsel %vm1613_vm4, %v757_v8, 0.0  ;;  %v759_v14 = vsel %vm1608_vm2, %v756_v56, 0.0  ;;  %v638_v19 = vsel %vm1657_vm12, %v637_v62, 0.0  ;;  %v639_v42 = vsel %vm1608_vm2, %v636_v12, 0.0 }
 0x231   : > { %v1256_v17 = vunpack.i.h.bf16 %v1254_v11  ;;  %v1255_v20 = vunpack.i.l.bf16 %v1254_v11  ;;  %v1241_v22 = vunpack.i.h.bf16 %v1239_v61  ;;  %v1891_v30 = vrot.slane %v758_v13, 4 }
 0x232   : > { %v1240_v31 = vunpack.i.l.bf16 %v1239_v61  ;;  %v1893_v34 = vrot.slane %v759_v14, 4  ;;  %v720_v47 = vsel %vm400_vm9, %v638_v19, %v698_v18  ;;  %v721_v55 = vsel %vm400_vm9, %v639_v42, %v699_v4 }
 0x233   : > { %v732_v35 = vsel %vm276_vm7, %v1255_v20, %v1256_v17  ;;  %v733_v38 = vsel %vm276_vm7, %v1256_v17, %v1255_v20 }
 0x234   : > { %v1264_v39 = vpop.permute.xlu0 %1263  ;;  %v1249_v41 = vpop.permute.xlu1 %1248  ;;  %v740_v43 = vsel %vm289_vm0, %v1240_v31, %v1241_v22  ;;  %v741_v45 = vsel %vm289_vm0, %v1241_v22, %v1240_v31  ;;  %v734_v53 = vsel %vm1657_vm12, %v733_v38, 0.0  ;;  %v735_v57 = vsel %vm1608_vm2, %v732_v35, 0.0 }
 0x235   : > { %v1266_v46 = vunpack.i.h.bf16 %v1264_v39  ;;  %v742_v48 = vsel %vm252_vm3, %v741_v45, 0.0  ;;  %v795_v49 = vrot.slane %v740_v43, 4  ;;  %v1265_v50 = vunpack.i.l.bf16 %v1264_v39 }
 0x236   : > { %v1251_v51 = vunpack.i.h.bf16 %v1249_v41  ;;  %v1250_v54 = vunpack.i.l.bf16 %v1249_v41  ;;  %v794_v58 = vrot.slane %v742_v48, 4  ;;  %vm2123_vm0 = vcmp.lt.s32.totalorder %v1599_v9, 127 }
 0x237   : > { %v668_v59 = vsel %vm2123_vm0, %v1265_v50, %v1266_v46  ;;  %vm2124_vm1 = vmmov %vm2123_vm0  ;;  %v1918_v7 = vsel %vm400_vm9, %v735_v57, %v795_v49  ;;  %vm2125_vm2 = vcmp.lt.s32.totalorder %v1599_v9, 15 }
 0x238   : > { %v669_v60 = vsel %vm2124_vm1, %v1266_v46, %v1265_v50  ;;  %v1274_v63 = vpop.permute.xlu0 %1273  ;;  %v1259_v5 = vpop.permute.xlu1 %1258  ;;  %v670_v44 = vsel %vm1617_vm5, %v668_v59, 0.0  ;;  %v652_v15 = vsel %vm2125_vm2, %v1250_v54, %v1251_v51  ;;  %vm2126_vm3 = vmmov %vm2125_vm2  ;;  %v816_v31 = vsel %vm400_vm9, %v734_v53, %v794_v58 }
 0x239   : > { %v671_v4 = vsel %vm1629_vm6, %v669_v60, 0.0  ;;  %v653_v62 = vsel %vm2126_vm3, %v1251_v51, %v1250_v54  ;;  %v1928_v56 = vrot.slane %v670_v44, 4  ;;  %v1276_v61 = vunpack.i.h.bf16 %v1274_v63  ;;  %vm2127_vm7 = vmmov %vm2123_vm0 }
 0x23a   : > { %v711_v8 = vrot.slane %v671_v4, 4  ;;  %v654_v11 = vsel %vm1668_vm14, %v653_v62, 0.0  ;;  %v1275_v12 = vunpack.i.l.bf16 %v1274_v63  ;;  %v1261_v13 = vunpack.i.h.bf16 %v1259_v5  ;;  %vm2128_vm12 = vmmov %vm2123_vm0 }
 0x23b   : > { %v1260_v14 = vunpack.i.l.bf16 %v1259_v5  ;;  %v655_v17 = vsel %vm1629_vm6, %v652_v15, 0.0  ;;  %v722_v22 = vsel %vm400_vm9, %v654_v11, %v704_v24  ;;  %vm2129_vm0 = vmmov %vm2125_vm2  ;;  %vm2134_vm3 = vcmp.lt.s32.totalorder %v1599_v9, 111 }
 0x23c   : > { %v1284_v18 = vpop.permute.xlu0 %1283  ;;  %v1269_v19 = vpop.permute.xlu1 %1268  ;;  %v723_v20 = vsel %vm400_vm9, %v655_v17, %v705_v25  ;;  %v1940_v35 = vsel %vm400_vm9, %v629_v6, %v711_v8  ;;  %v764_v38 = vsel %vm2127_vm7, %v1275_v12, %v1276_v61  ;;  %v765_v39 = vsel %vm2128_vm12, %v1276_v61, %v1275_v12  ;;  %vm2130_vm1 = vmmov %vm2129_vm0 }
 0x23d   : > { %v748_v41 = vsel %vm2129_vm0, %v1260_v14, %v1261_v13  ;;  %v749_v25 = vsel %vm2130_vm1, %v1261_v13, %v1260_v14  ;;  %v766_v24 = vsel %vm1617_vm5, %v764_v38, 0.0  ;;  %v767_v27 = vsel %vm1629_vm6, %v765_v39, 0.0  ;;  %vm2135_vm7 = vmmov %vm2134_vm3 }
 0x23e   : > { %v750_v6 = vsel %vm1668_vm14, %v749_v25, 0.0  ;;  %v1286_v42 = vunpack.i.h.bf16 %v1284_v18  ;;  %v1956_v43 = vrot.slane %v766_v24, 4  ;;  %v807_v45 = vrot.slane %v767_v27, 4 }
 0x23f   : > { %v1285_v46 = vunpack.i.l.bf16 %v1284_v18  ;;  %v1271_v48 = vunpack.i.h.bf16 %v1269_v19  ;;  %v1270_v49 = vunpack.i.l.bf16 %v1269_v19  ;;  %v825_v50 = vpack.c.bf16 %v723_v20, %v721_v55 }
 0x240   : > { %v824_v51 = vpack.c.bf16 %v722_v22, %v720_v47  ;;  %v1294_v53 = vpop.permute.xlu0 %1293  ;;  %v1279_v54 = vpop.permute.xlu1 %1278  ;;  %v751_v57 = vsel %vm1629_vm6, %v748_v41, 0.0  ;;  %vm2131_vm14 = vcmp.lt.s32.totalorder %v1599_v9, 112  ;;  %vm2133_vm6 = vcmp.lt.s32.totalorder %v1602_v10, 240 }
 0x241   : > { %v676_v58 = vsel %vm341_vm15, %v1285_v46, %v1286_v42  ;;  %v677_v52 = vsel %vm341_vm15, %v1286_v42, %v1285_v46  ;;  %v1296_v59 = vunpack.i.h.bf16 %v1294_v53  ;;  %v1295_v60 = vunpack.i.l.bf16 %v1294_v53  ;;  %vm2132_vm2 = vmmov %vm2131_vm14  ;;  %858 = vmatprep.subr.bf16.mxu0 %v825_v50 }
 0x242   : > { %v678_v63 = vsel %vm1613_vm4, %v676_v58, 0.0  ;;  %v684_v55 = vsel %vm2131_vm14, %v1270_v49, %v1271_v48  ;;  %v685_v47 = vsel %vm2132_vm2, %v1271_v48, %v1270_v49  ;;  %v1281_v28 = vunpack.i.h.bf16 %v1279_v54  ;;  %859 = vmatpush1.bf16.msra.mxu0 %v824_v51  ;;  %vm2136_vm12 = vmmov %vm2132_vm2 }
 0x243   : > { %v687_v5 = vsel %vm2133_vm6, %v685_v47, 0.0  ;;  %v716_v44 = vrot.slane %v684_v55, 4  ;;  %v692_v4 = vsel %vm2134_vm3, %v1295_v60, %v1296_v59  ;;  %v693_v15 = vsel %vm2135_vm7, %v1296_v59, %v1295_v60  ;;  %vm2137_vm0 = vmmov %vm2132_vm2 }
 0x244   : > { %v717_v62 = vrot.slane %v687_v5, 4  ;;  %v695_v8 = vsel %vm1781_vm11, %v693_v15, 0.0  ;;  %v1280_v11 = vunpack.i.l.bf16 %v1279_v54  ;;  %v819_v61 = vsel %vm400_vm9, %v751_v57, %v1893_v34  ;;  %v1289_v12 = vpop.permute.xlu1 %1288  ;;  %vm2138_vm1 = vmmov %vm2133_vm6 }
 0x245   : > { %v827_v13 = vpack.c.bf16 %v819_v61, %v1918_v7  ;;  %v818_v14 = vsel %vm400_vm9, %v750_v6, %v1891_v30  ;;  %v1291_v17 = vunpack.i.h.bf16 %v1289_v12  ;;  %v1290_v18 = vunpack.i.l.bf16 %v1289_v12 }
 0x246   : > { %v780_v19 = vsel %vm2136_vm12, %v1280_v11, %v1281_v28  ;;  %v781_v20 = vsel %vm2137_vm0, %v1281_v28, %v1280_v11  ;;  %v826_v22 = vpack.c.bf16 %v818_v14, %v816_v31  ;;  %v679_v38 = vsel %vm1761_vm10, %v677_v52, 0.0 }
 0x247   : > { %v783_v34 = vsel %vm2138_vm1, %v781_v20, 0.0  ;;  %v812_v39 = vrot.slane %v780_v19, 4  ;;  %899 = vmatprep.subr.bf16.mxu1 %v827_v13  ;;  %v772_v30 = vsel %vm341_vm15, %v1290_v18, %v1291_v17  ;;  %v773_v7 = vsel %vm341_vm15, %v1291_v17, %v1290_v18  ;;  %vm2140_vm15 = vmmov %vm2134_vm3 }
 0x248   : > { %v813_v41 = vrot.slane %v783_v34, 4  ;;  %900 = vmatpush1.bf16.msra.mxu1 %v826_v22  ;;  %v774_v25 = vsel %vm1613_vm4, %v772_v30, 0.0  ;;  %v727_v31 = vsel %vm400_vm9, %v679_v38, %v717_v62  ;;  %v724_v10 = vsel %vm400_vm9, %v628_v32, %v1928_v56  ;;  %v1299_v24 = vpop.permute.xlu1 %1298  ;;  %vm2139_vm4 = vmmov %vm2134_vm3 }
 0x249   : > { %v829_v27 = vpack.c.bf16 %v727_v31, %v1940_v35  ;;  %v726_v6 = vsel %vm400_vm9, %v678_v63, %v716_v44  ;;  %v1301_v42 = vunpack.i.h.bf16 %v1299_v24  ;;  %v1300_v46 = vunpack.i.l.bf16 %v1299_v24 }
 0x24a   : > { %v828_v48 = vpack.c.bf16 %v726_v6, %v724_v10  ;;  %v833_v49 = vpack.c.bf16 %v695_v8, %v695_v8  ;;  %v694_v16 = vsel %vm1617_vm5, %v692_v4, 0.0  ;;  %v775_v50 = vsel %vm1761_vm10, %v773_v7, 0.0 }
 0x24b   : > { %860 = vmatprep.subr.bf16.mxu0 %v829_v27  ;;  %v788_v23 = vsel %vm2139_vm4, %v1300_v46, %v1301_v42  ;;  %v789_v32 = vsel %vm2140_vm15, %v1301_v42, %v1300_v46  ;;  %v832_v56 = vpack.c.bf16 %v694_v16, %v694_v16  ;;  %v821_v35 = vsel %vm400_vm9, %v631_v37, %v807_v45 }
 0x24c   : > { %861 = vmatpush1.bf16.msra.mxu0 %v828_v48  ;;  %v791_v51 = vsel %vm1781_vm11, %v789_v32, 0.0  ;;  %v823_v53 = vsel %vm400_vm9, %v775_v50, %v813_v41  ;;  %v820_v33 = vsel %vm400_vm9, %v630_v36, %v1956_v43  ;;  %v822_v54 = vsel %vm400_vm9, %v774_v25, %v812_v39 }
 0x24d   : > { %v835_v9 = vpack.c.bf16 %v791_v51, %v791_v51  ;;  %1066 = vmatprep.subr.msk.bf16.mxu0 %vm533_vm13, %v833_v49  ;;  %v831_v57 = vpack.c.bf16 %v823_v53, %v821_v35  ;;  %v830_v29 = vpack.c.bf16 %v822_v54, %v820_v33  ;;  %v790_v37 = vsel %vm1617_vm5, %v788_v23, 0.0 }
 0x24e   : > { %v847_v40 = vsel %vm533_vm13, %v832_v56, 0  ;;  %v834_v45 = vpack.c.bf16 %v790_v37, %v790_v37 }
 0x24f   : > { %901 = vmatprep.subr.bf16.mxu1 %v831_v57 }
 0x250   : > { %863 = vmatpush1.bf16.msra.mxu0 %v847_v40  ;;  %902 = vmatpush1.bf16.msra.mxu1 %v830_v29  ;;  %v853_v36 = vsel %vm533_vm13, %v834_v45, 0 }
 0x251   : > { %1068 = vmatprep.subr.msk.bf16.mxu1 %vm533_vm13, %v835_v9  ;;  %v841_v21 = vpop.permute.xlu0 %840 }
 0x253   : > { %1067 = vmatmul.mubr.msk.bf16.vlgmr.msra.gmra.mrb[4].mxu0 %vm529_vm8, %v836_v26 }
 0x254   : > { %904 = vmatpush1.bf16.msra.mxu1 %v853_v36 }
 0x257   : > { %1069 = vmatmul.mubr.msk.bf16.vlgmr.msra.gmra.mrb[4].mxu1 %vm529_vm8, %v836_v26 }
 0x326   : > { %v892_v43 = vpop.f32.mrb[4].mxu0 }
 0x327   : > { %v893_v58 = vadd.f32 %v892_v43, %v841_v21  ;;  %v894_v52 = vpop.f32.mrb[5].mxu0 }
 0x328   : > { %v895_v59 = vadd.f32 %v894_v52, %v841_v21  ;;  %v896_v60 = vpop.f32.mrb[6].mxu0 }
 0x329   : > { %v940_v63 = vadd.f32 %v893_v58, %v1561_v0  ;;  %v897_v55 = vpop.f32.mrb[7].mxu0 }
 0x32a   : > { %v941_v47 = vadd.f32 %v895_v59, %v1567_v2  ;;  %v933_v28 = vpop.f32.mrb[4].mxu1 }
 0x32b   : > { %v942_v5 = vmax.f32 %v940_v63, 0.0  ;;  %v934_v44 = vadd.f32 %v933_v28, %v841_v21  ;;  %v935_v4 = vpop.f32.mrb[5].mxu1 }
 0x32c   : > { %v943_v15 = vmax.f32 %v941_v47, 0.0  ;;  %v936_v62 = vadd.f32 %v935_v4, %v841_v21  ;;  %v937_v8 = vpop.f32.mrb[6].mxu1 }
 0x32d   : > { %v953_v11 = vadd.f32 %v1563_v1, %v934_v44  ;;  %v938_v61 = vpop.f32.mrb[7].mxu1 }
 0x32e   : > { %v946_v0 = vcombine.low %v942_v5, %v943_v15  ;;  %v954_v12 = vadd.f32 %v936_v62, %v1571_v3 }
 0x32f   : > { %v955_v2 = vmax.f32 %v953_v11, 0.0 }
 0x330   : > { %948 = vst [vmem:[%s243_s14] sm:$0xff] %v946_v0  ;;  %v956_v13 = vmax.f32 %v954_v12, 0.0 }
 0x332   : > { %v959_v14 = vcombine.low %v955_v2, %v956_v13 }
 0x334   : > { %1071 = vst [vmem:[%s243_s14 + $0x8] sm:$0xff] %v959_v14 }
 0x335   : > { %1347 = shalt.err (!%p1344_p2)
}
 0x336   : > { %s1348_s17 = scalar_lea.hbm %s2046_s25, 256  ;;  %s1352_s12 = scalar_lea.hbm %s2095_s5, 512 }
 0x337   : > { %p1349_p4 = scmp.ne.s32.totalorder %s2046_s25, %s1348_s17  ;;  %p1353_p9 = scmp.lt.u32.totalorder %s2046_s25, %s2095_s5 }
 0x338   : > { %p1354_p1 = scmp.lt.u32.totalorder %s1352_s12, %s1348_s17  ;;  %p1356_p6 = scmp.lt.u32.totalorder %s1348_s17, %s2046_s25 }
 0x339   : > { %p1350_p5 = pnand %p1349_p4, %p2141_p11 }
 0x33a   : > { %p1355_p3 = por %p1354_p1, %p1353_p9 }
 0x33b   : > { %p1351_p7 = pneg %p1350_p5 }
 0x33c   : > { %p1357_p12 = por %p1356_p6, %p1355_p3 }
 0x33e   : > { %p1358_p13 = pnand %p1357_p12, %p1351_p7 }
 0x340   : > { %1361 = shalt.err (!%p1358_p13)
}
 0x341   : > { %s1415_s16 = smov 128   ;;  %s1416_s8 = smov 8  }
 0x342   : > { %1084 = dma.vmem_to_hbm [thread:$0]  (%p2141_p11), %s2041_s15, 256, %s2046_s25, %s964_s9, %s1415_s16, %s1415_s16, %s1416_s8  }
 0x343 PF: > { %s993_s7 = sand.u32 1, %s1388_s18   ;;  %p2142_p8 = scmp.ne.s32.totalorder %s2105_s6, 0 }
 0x344   : > { %p2143_p10 = scmp.ge.s32.totalorder %s1400_s21, 2  ;;  %s994_s10 = scalar_lea.sflag [#allocation4], %s993_s7 }
 0x346   : > { %p1091_p0 = pnand %p2143_p10, %p2142_p8 }
 0x348   : > { %1383 = dma.done.wait (!%p1091_p0), %s994_s10, 256  }
 0x349   : > { %1385 = vsyncadd (!%p1091_p0), %s994_s10, 4294967040  ;;  %p18_p2 = scmp.ge.s32.totalorder %s1472_s24, 4   ;;  %s2144_s18 = smov %s1392_s19 }
 0x34a   : > { %s2145_s19 = smov %s1396_s20  ;;  %s2146_s20 = smov %s1484_s27 }
 0x34b   : > { %s2147_s21 = smov %s1472_s24  ;;  %20 = sbr.rel (!%p18_p2) target bundleno = 5 (0x5), region = 87 }
 0x352   :  { %999 = vsyncpa [#allocation3], 1 }
 0x353   :  { %1001 = vsyncpa [#allocation3 + $0x1], 1 }
 0x354   :  { %1002 = vsyncpa [#allocation4], 1 }
 0x355   :  { %1004 = vsyncpa [#allocation4 + $0x1], 1 }

</bundles_post_ra>
